<compile_context>
chip_gen: v7x
topology: tpu7x:2x2x1
jax: 0.10.0
libtpu: 0.0.40
codegen_flags: <defaults>
</compile_context>

<pallas_src>
import math

import jax
import jax.numpy as jnp
from jax.experimental import pallas as pl
from jax.experimental.pallas import tpu as pltpu

_MAX_TILE_M = 256  # MXU-friendly, multiple of 8, bounds per-step VMEM


def _embed_kernel(x_ref, w_ref, pb_ref, o_ref):
    # x_ref : (tile_m, patch_dim)   patch rows for this tile
    # w_ref : (patch_dim, in_dim)   projection weight (already transposed)
    # pb_ref: (tile_m, in_dim)      positional embedding + bias (f32)
    # o_ref : (tile_m, in_dim)
    y = jnp.dot(x_ref[...], w_ref[...], preferred_element_type=jnp.float32)
    o_ref[...] = (y + pb_ref[...]).astype(o_ref.dtype)


def _patchify(x, patch_size):
    """nn.Unfold(kernel_size=p, stride=p) followed by transpose(-1, -2).

    (B, C, H, W) -> (B, num_patch, C*p*p), channel-major (c, kh, kw) per
    patch, patches in row-major spatial order (matches PyTorch).
    """
    B, C, H, W = x.shape
    p = patch_size
    gh, gw = H // p, W // p
    x = x.reshape(B, C, gh, p, gw, p)
    x = jnp.transpose(x, (0, 2, 4, 1, 3, 5))      # (B, gh, gw, C, p, p)
    return x.reshape(B, gh * gw, C * p * p)


def _flat_tile_rows(num_patch, total_rows, max_tile=_MAX_TILE_M):
    """Rows per tile for the flattened (B*N, P) layout, or None if not usable.

    A valid flat tile must be a multiple of num_patch (so the replicated
    pos+bias tile is identical for every block) and either the full flattened
    extent or a multiple of 8 (sublane constraint).
    """
    if total_rows <= max_tile:
        return total_rows                      # full extent: always legal
    step = math.lcm(num_patch, 8)
    if step > max_tile:
        return None
    return (max_tile // step) * step


def _vmem_limit(tile_m, patch_dim, in_dim, x_item, w_item, out_item):
    # Double-buffered inputs/outputs per grid step, with 2x margin; never drop
    # below the 32 MiB default scoped limit, never exceed v7x's 64 MiB VMEM.
    per_step = (2 * tile_m * patch_dim * x_item
                + 2 * patch_dim * in_dim * w_item
                + 2 * tile_m * in_dim * 4
                + 2 * tile_m * in_dim * out_item)
    return int(min(max(2 * per_step, 32 << 20), 64 << 20))


def embedding_forward(x, weight, bias, pos_embed, patch_size, *,
                      compute_dtype=None):
    """Forward of Embedding: unfold -> linear -> + position_embed.

    x:         (B, C, H, W)
    weight:    (in_dim, patch_dim)   PyTorch nn.Linear layout
    bias:      (in_dim,)
    pos_embed: (1, num_patch, in_dim)
    returns    (B, num_patch, in_dim) in x.dtype
    """
    B, C, H, W = x.shape
    in_dim, patch_dim = weight.shape
    num_patch = (H // patch_size) * (W // patch_size)
    out_dtype = x.dtype
    out_item = jnp.dtype(out_dtype).itemsize

    patches = _patchify(x, patch_size)                       # (B, N, P)
    w_t = weight.T                                           # (P, D)
    # Fold bias into the positional embedding (kept f32 so the elementwise add
    # inside the kernel stays f32 on all generations).
    pos_bias = pos_embed[0].astype(jnp.float32) + bias.astype(jnp.float32)  # (N, D)

    if compute_dtype is not None:
        patches = patches.astype(compute_dtype)
        w_t = w_t.astype(compute_dtype)

    cost = pl.CostEstimate(
        flops=2 * B * num_patch * patch_dim * in_dim,
        transcendentals=0,
        bytes_accessed=(patches.size * patches.dtype.itemsize
                        + w_t.size * w_t.dtype.itemsize
                        + pos_bias.size * 4
                        + B * num_patch * in_dim * out_item),
    )

    total_rows = B * num_patch
    flat_tile = _flat_tile_rows(num_patch, total_rows)

    # TODO(synk): for very large patch_dim (>~16K) a K-tiled accumulator pass
    # would be needed to bound VMEM; omitted since this module is small.
    if flat_tile is not None:
        # Flattened (B*N, P) @ (P, D): bigger MXU tiles, fewer grid steps;
        # pos+bias tile is VMEM-resident via a constant index_map.
        patches_flat = patches.reshape(total_rows, patch_dim)
        pb_tile = jnp.tile(pos_bias, (flat_tile // num_patch, 1))  # (tile, D)
        grid = (pl.cdiv(total_rows, flat_tile),)
        out = pl.pallas_call(
            _embed_kernel,
            out_shape=jax.ShapeDtypeStruct((total_rows, in_dim), out_dtype),
            grid_spec=pltpu.PrefetchScalarGridSpec(
                num_scalar_prefetch=0,
                grid=grid,
                in_specs=[
                    pl.BlockSpec((flat_tile, patch_dim), lambda m: (m, 0)),
                    pl.BlockSpec((patch_dim, in_dim), lambda m: (0, 0)),
                    pl.BlockSpec((flat_tile, in_dim), lambda m: (0, 0)),
                ],
                out_specs=pl.BlockSpec((flat_tile, in_dim), lambda m: (m, 0)),
            ),
            compiler_params=pltpu.CompilerParams(
                dimension_semantics=("parallel",),
                vmem_limit_bytes=_vmem_limit(flat_tile, patch_dim, in_dim,
                                             patches.dtype.itemsize,
                                             w_t.dtype.itemsize, out_item),
                allow_input_fusion=[True, True, True],
            ),
            cost_estimate=cost,
        )(patches_flat, w_t, pb_tile)
        return out.reshape(B, num_patch, in_dim)

    # Per-batch fallback: num_patch too large for the flattened tiling.
    tile_m = num_patch if num_patch <= _MAX_TILE_M else _MAX_TILE_M
    grid = (B, pl.cdiv(num_patch, tile_m))
    out = pl.pallas_call(
        _embed_kernel,
        out_shape=jax.ShapeDtypeStruct((B, num_patch, in_dim), out_dtype),
        grid_spec=pltpu.PrefetchScalarGridSpec(
            num_scalar_prefetch=0,
            grid=grid,
            in_specs=[
                pl.BlockSpec((pl.Squeezed(), tile_m, patch_dim),
                             lambda b, m: (b, m, 0)),
                pl.BlockSpec((patch_dim, in_dim), lambda b, m: (0, 0)),
                pl.BlockSpec((tile_m, in_dim), lambda b, m: (m, 0)),
            ],
            out_specs=pl.BlockSpec((pl.Squeezed(), tile_m, in_dim),
                                   lambda b, m: (b, m, 0)),
        ),
        compiler_params=pltpu.CompilerParams(
            dimension_semantics=("parallel", "parallel"),
            vmem_limit_bytes=_vmem_limit(tile_m, patch_dim, in_dim,
                                         patches.dtype.itemsize,
                                         w_t.dtype.itemsize, out_item),
            allow_input_fusion=[True, True, True],
        ),
        cost_estimate=cost,
    )(patches, w_t, pos_bias)
    return out


def _reference(x, weight, bias, pos_embed, patch_size):
    patches = _patchify(x, patch_size)
    y = jnp.einsum("bnp,dp->bnd", patches, weight) + bias
    return y + pos_embed


def _run_case(key, batch, in_dim, patch_size, img_size, *, compute_dtype=None,
              atol=1e-4, rtol=1e-4):
    num_patch = (img_size // patch_size) ** 2
    patch_dim = in_dim * patch_size ** 2
    kx, kw, kb, kp = jax.random.split(key, 4)
    x = jax.random.normal(kx, (batch, in_dim, img_size, img_size), jnp.float32)
    # Deterministic synthetic parameters (not a checkpoint load).
    weight = jax.random.normal(kw, (in_dim, patch_dim), jnp.float32) * 0.05
    bias = jax.random.normal(kb, (in_dim,), jnp.float32) * 0.05
    pos_embed = jax.random.normal(kp, (1, num_patch, in_dim), jnp.float32)

    ref = _reference(x, weight, bias, pos_embed, patch_size)
    out = embedding_forward(x, weight, bias, pos_embed, patch_size,
                            compute_dtype=compute_dtype)
    out = jax.block_until_ready(out)
    assert out.shape == (batch, num_patch, in_dim), out.shape
    err = float(jnp.max(jnp.abs(out - ref)))
    assert jnp.allclose(out, ref, atol=atol, rtol=rtol), err


if __name__ == "__main__":
    key = jax.random.PRNGKey(0)
    keys = jax.random.split(key, 4)

    # Canonical small shape (flattened single-step path: 32 rows, 1 grid step).
    _run_case(keys[0], batch=2, in_dim=8, patch_size=4, img_size=16)

    # bf16-operand MXU path on the same shape (accumulation stays f32).
    _run_case(keys[1], batch=2, in_dim=8, patch_size=4, img_size=16,
              compute_dtype=jnp.bfloat16, atol=5e-2, rtol=5e-2)

    # Multi-step flattened path with an edge (padded) block:
    # num_patch=64, total rows=320 -> tile 256, grid=(2,).
    _run_case(keys[2], batch=5, in_dim=8, patch_size=2, img_size=16)

    # Per-batch fallback path: num_patch=484 (>256, lcm with 8 too large),
    # grid=(2, 2) with a padded edge tile.
    _run_case(keys[3], batch=2, in_dim=4, patch_size=2, img_size=44)

    print("KERNEL_OK")
</pallas_src>

<mosaic_0001>
module attributes {stable_mosaic.version = 11 : i64} {
  func.func @_embed_kernel(%arg0: i32, %arg1: memref<32x128xf32, #tpu.memory_space<vmem>>, %arg2: memref<128x8xf32, #tpu.memory_space<vmem>>, %arg3: memref<32x8xf32, #tpu.memory_space<vmem>>, %arg4: memref<32x8xf32, #tpu.memory_space<vmem>>) attributes {dimension_semantics = [#tpu.dimension_semantics<parallel>], iteration_bounds = array<i64: 1>, scalar_prefetch = 0 : i64, scratch_operands = 0 : i64, tpu.core_type = #tpu.core_type<tc>, window_params = [{transform_indices = @transform_0, window_bounds = array<i64: 32, 128>}, {pipeline_mode = #tpu.pipeline_mode<synchronous>, transform_indices = @transform_1, window_bounds = array<i64: 128, 8>}, {pipeline_mode = #tpu.pipeline_mode<synchronous>, transform_indices = @transform_2, window_bounds = array<i64: 32, 8>}, {transform_indices = @transform_3, window_bounds = array<i64: 32, 8>}]} {
    %c0 = arith.constant 0 : index
    %c0_0 = arith.constant 0 : index
    %0 = vector.load %arg1[%c0, %c0_0] : memref<32x128xf32, #tpu.memory_space<vmem>>, vector<32x128xf32>
    %c0_1 = arith.constant 0 : index
    %c0_2 = arith.constant 0 : index
    %1 = vector.load %arg2[%c0_1, %c0_2] : memref<128x8xf32, #tpu.memory_space<vmem>>, vector<128x8xf32>
    %cst = arith.constant dense<0.000000e+00> : vector<32x8xf32>
    %2 = tpu.matmul %0, %1, %cst {dimension_numbers = #tpu.dot_dimension_numbers<[1], [0], [0], [1], [0, 0, 1, 1], [], []>} : vector<32x128xf32>, vector<128x8xf32>, vector<32x8xf32> -> vector<32x8xf32>
    %c0_3 = arith.constant 0 : index
    %c0_4 = arith.constant 0 : index
    %3 = vector.load %arg3[%c0_3, %c0_4] : memref<32x8xf32, #tpu.memory_space<vmem>>, vector<32x8xf32>
    %4 = arith.addf %2, %3 : vector<32x8xf32>
    %c0_5 = arith.constant 0 : index
    %c0_6 = arith.constant 0 : index
    %5 = vector.load %arg4[%c0_5, %c0_6] : memref<32x8xf32, #tpu.memory_space<vmem>>, vector<32x8xf32>
    tpu.vector_store %arg4[%c0_5, %c0_6], %4 {strides = array<i32>} : memref<32x8xf32, #tpu.memory_space<vmem>>, vector<32x8xf32>,
    return
  }
  func.func @transform_0(%arg0: i32) -> (i32, i32) {
    %c0_i32 = arith.constant 0 : i32
    %c0_i32_0 = arith.constant 0 : i32
    return %arg0, %c0_i32 : i32, i32
  }
  func.func @transform_1(%arg0: i32) -> (i32, i32) {
    %c0_i32 = arith.constant 0 : i32
    %c0_i32_0 = arith.constant 0 : i32
    %c0_i32_1 = arith.constant 0 : i32
    return %c0_i32, %c0_i32_0 : i32, i32
  }
  func.func @transform_2(%arg0: i32) -> (i32, i32) {
    %c0_i32 = arith.constant 0 : i32
    %c0_i32_0 = arith.constant 0 : i32
    %c0_i32_1 = arith.constant 0 : i32
    return %c0_i32, %c0_i32_0 : i32, i32
  }
  func.func @transform_3(%arg0: i32) -> (i32, i32) {
    %c0_i32 = arith.constant 0 : i32
    %c0_i32_0 = arith.constant 0 : i32
    return %arg0, %c0_i32 : i32, i32
  }
}

</mosaic_0001>

<bundles_post_ra>
// kernel: tpu_custom_call.1
= control target key start
LH: loop header
LB: loop body
LE: loop exit
PB: predicated region body
PF: predicated region fallthrough
CT: control target
= control target key end

     0   :  { %vm123_vm0 = vcmask 64512   ;;  %s342_s1 = inlined_call_operand.vmem [shape: f32[128,8], index: 1, kind: input, shape index: {}]   ;;  %s343_s0 = inlined_call_operand.vmem [shape: f32[32,128], index: 0, kind: input, shape index: {}]   ;;  %s344_s2 = inlined_call_operand.vmem [shape: f32[32,8], index: 2, kind: input, shape index: {}]   ;;  %s345_s3 = inlined_call_operand.vmem [shape: f32[32,8], index: 3, kind: output, shape index: {}]  }
   0x1   :  { %v18_v0 = vld [vmem:[%s342_s1] sm:$0xff]  ;;  %v19_v1 = vld [vmem:[%s342_s1 + $0x8] sm:$0xff]  ;;  %v20_v2 = vld [vmem:[%s342_s1 + $0x10] sm:$0xff] }
   0x2   :  { %v190_v3 = vpack.c.bf16 %v19_v1, %v18_v0  ;;  %v21_v4 = vld [vmem:[%s342_s1 + $0x18] sm:$0xff]  ;;  %v22_v6 = vld [vmem:[%s342_s1 + $0x20] sm:$0xff]  ;;  %v23_v7 = vld [vmem:[%s342_s1 + $0x28] sm:$0xff] }
   0x3   :  { %v194_v5 = vpack.c.bf16 %v21_v4, %v20_v2  ;;  %v198_v8 = vpack.c.bf16 %v23_v7, %v22_v6  ;;  %v14_v9 = vld [vmem:[%s343_s0] sm:$0xff]  ;;  %v16_v10 = vld [vmem:[%s343_s0 + $0x10] sm:$0xff]  ;;  %v25_v12 = vld [vmem:[%s342_s1 + $0x38] sm:$0xff] }
   0x4   :  { %191 = vmatprep.subr.bf16.mxu0 %v190_v3  ;;  %222 = vmatprep.subr.bf16.mxu1 %v190_v3  ;;  %v24_v11 = vld [vmem:[%s342_s1 + $0x30] sm:$0xff]  ;;  %v26_v14 = vld [vmem:[%s342_s1 + $0x40] sm:$0xff]  ;;  %v27_v15 = vld [vmem:[%s342_s1 + $0x48] sm:$0xff] }
   0x5   :  { %193 = vmatpush3.bf16.msra.mxu0 %v190_v3  ;;  %230 = vmatpush3.bf16.msra.mxu1 %v190_v3  ;;  %v202_v13 = vpack.c.bf16 %v25_v12, %v24_v11  ;;  %v206_v16 = vpack.c.bf16 %v27_v15, %v26_v14  ;;  %v28_v17 = vld [vmem:[%s342_s1 + $0x50] sm:$0xff]  ;;  %v29_v18 = vld [vmem:[%s342_s1 + $0x58] sm:$0xff]  ;;  %v30_v20 = vld [vmem:[%s342_s1 + $0x60] sm:$0xff] }
   0x6   :  { %195 = vmatprep.subr.bf16.mxu0 %v194_v5  ;;  %223 = vmatprep.subr.bf16.mxu1 %v194_v5  ;;  %v210_v19 = vpack.c.bf16 %v29_v18, %v28_v17  ;;  %v31_v21 = vld [vmem:[%s342_s1 + $0x68] sm:$0xff]  ;;  %v32_v23 = vld [vmem:[%s342_s1 + $0x70] sm:$0xff]  ;;  %v33_v24 = vld [vmem:[%s342_s1 + $0x78] sm:$0xff] }
   0x7   :  { %184 = vmatprep.mubr.f32.mxu0 %v14_v9  ;;  %187 = vmatprep.mubr.f32.mxu1 %v16_v10  ;;  %v214_v22 = vpack.c.bf16 %v31_v21, %v30_v20  ;;  %v218_v25 = vpack.c.bf16 %v33_v24, %v32_v23  ;;  %v15_v26 = vld [vmem:[%s343_s0 + $0x8] sm:$0xff]  ;;  %v17_v27 = vld [vmem:[%s343_s0 + $0x18] sm:$0xff]  ;;  %v34_v30 = vld [vmem:[%s344_s2] sm:$0xff] }
   0x8   :  { %v35_v28 = vld [vmem:[%s344_s2 + $0x8] sm:$0xff]  ;;  %v37_v29 = vld [vmem:[%s344_s2 + $0x18] sm:$0xff]  ;;  %v36_v31 = vld [vmem:[%s344_s2 + $0x10] sm:$0xff] }
   0x9   :  { %197 = vmatpush3.bf16.msra.mxu0 %v194_v5  ;;  %231 = vmatpush3.bf16.msra.mxu1 %v194_v5 }
   0xa   :  { %199 = vmatprep.subr.bf16.mxu0 %v198_v8  ;;  %224 = vmatprep.subr.bf16.mxu1 %v198_v8 }
   0xd   :  { %201 = vmatpush3.bf16.msra.mxu0 %v198_v8  ;;  %232 = vmatpush3.bf16.msra.mxu1 %v198_v8 }
   0xe   :  { %203 = vmatprep.subr.bf16.mxu0 %v202_v13  ;;  %225 = vmatprep.subr.bf16.mxu1 %v202_v13 }
  0x11   :  { %205 = vmatpush3.bf16.msra.mxu0 %v202_v13  ;;  %233 = vmatpush3.bf16.msra.mxu1 %v202_v13 }
  0x12   :  { %207 = vmatprep.subr.bf16.mxu0 %v206_v16  ;;  %226 = vmatprep.subr.bf16.mxu1 %v206_v16 }
  0x15   :  { %209 = vmatpush3.bf16.msra.mxu0 %v206_v16  ;;  %234 = vmatpush3.bf16.msra.mxu1 %v206_v16 }
  0x16   :  { %211 = vmatprep.subr.bf16.mxu0 %v210_v19  ;;  %227 = vmatprep.subr.bf16.mxu1 %v210_v19 }
  0x19   :  { %213 = vmatpush3.bf16.msra.mxu0 %v210_v19  ;;  %235 = vmatpush3.bf16.msra.mxu1 %v210_v19 }
  0x1a   :  { %215 = vmatprep.subr.bf16.mxu0 %v214_v22  ;;  %228 = vmatprep.subr.bf16.mxu1 %v214_v22 }
  0x1d   :  { %217 = vmatpush3.bf16.msra.mxu0 %v214_v22  ;;  %236 = vmatpush3.bf16.msra.mxu1 %v214_v22 }
  0x1e   :  { %219 = vmatprep.subr.bf16.mxu0 %v218_v25  ;;  %229 = vmatprep.subr.bf16.mxu1 %v218_v25 }
  0x21   :  { %221 = vmatpush3.bf16.msra.mxu0 %v218_v25  ;;  %237 = vmatpush3.bf16.msra.mxu1 %v218_v25 }
  0x24   :  { %185 = vmatmul.mubr.f32.vlgmr.msra.gmra.mrb[0].mxu0 %v15_v26  ;;  %188 = vmatmul.mubr.f32.vlgmr.msra.gmra.mrb[0].mxu1 %v17_v27 }
  0xf7   :  { %v186_v32 = vpop.f32.mrb[0].mxu0  ;;  %v189_v33 = vpop.f32.mrb[0].mxu1 }
  0xf8   :  { %v110_v34 = vadd.f32 %v186_v32, %v35_v28  ;;  %v120_v35 = vadd.f32 %v189_v33, %v37_v29  ;;  %v104_v36 = vpop.f32.mrb[1].mxu0  ;;  %v114_v37 = vpop.f32.mrb[1].mxu1 }
  0xf9   :  { %v105_v38 = vadd.f32 %v104_v36, %v34_v30  ;;  %v115_v39 = vadd.f32 %v114_v37, %v36_v31 }
  0xfa   :  { %125 = vst.msk [vmem:[%s345_s3 + $0x8] sm:$0xff] %vm123_vm0, %v110_v34  ;;  %127 = vst.msk [vmem:[%s345_s3 + $0x18] sm:$0xff] %vm123_vm0, %v120_v35 }
  0xfb   :  { %124 = vst.msk [vmem:[%s345_s3] sm:$0xff] %vm123_vm0, %v105_v38  ;;  %126 = vst.msk [vmem:[%s345_s3 + $0x10] sm:$0xff] %vm123_vm0, %v115_v39 }

</bundles_post_ra>
